<compile_context>
chip_gen: v5e
topology: v5e:2x2
jax: 0.10.0
libtpu: 0.0.40
codegen_flags: <defaults>
</compile_context>

<pallas_src>
import functools

import jax
import jax.numpy as jnp
from jax import lax
from jax.experimental import pallas as pl
from jax.experimental.pallas import tpu as pltpu


def _elementwise_loss(d, loss_type):
    if loss_type == "l2":
        return d * d
    elif loss_type == "l1":
        return jnp.abs(d)
    elif loss_type == "l1_smooth":
        ad = jnp.abs(d)
        # SmoothL1Loss with default beta=1.0
        return jnp.where(ad < 1.0, 0.5 * d * d, ad - 0.5)
    else:
        raise ValueError(f"unknown loss type: {loss_type}")


def _recons_loss_kernel(pred_ref, gt_ref, acc_ref, *, loss_type, rows, tile,
                        total_steps, steps_per_part, num_parts, has_tail):
    """pred_ref/gt_ref: (tile, D) VMEM input tiles.
    acc_ref: (8, D) f32 output block, resident across the reduction (step) axis;
    holds per-(row-slot mod 8, column) partial sums for this partition.
    """
    if num_parts > 1:
        p = pl.program_id(0)
        j = pl.program_id(1)
    else:
        p = 0
        j = pl.program_id(0)

    @pl.when(j == 0)
    def _():
        acc_ref[...] = jnp.zeros_like(acc_ref)

    d = pred_ref[...].astype(jnp.float32) - gt_ref[...].astype(jnp.float32)
    e = _elementwise_loss(d, loss_type)
    D = e.shape[-1]

    def _accumulate(ev):
        # Row-group reduction (tile, D) -> (8, D): pure cross-vreg VALU adds
        # (the reshape splits the sublane dim by the native sublane tile of 8,
        # so it is layout-preserving).
        acc_ref[...] += jnp.sum(ev.reshape(tile // 8, 8, D), axis=0)

    if has_tail:
        gstep = p * steps_per_part + j
        is_tail = gstep >= total_steps - 1

        @pl.when(jnp.logical_not(is_tail))
        def _():
            _accumulate(e)

        @pl.when(is_tail)
        def _():
            # Mask out-of-range rows (partial last block / overshoot steps)
            # BEFORE adding into the accumulator.
            start = gstep * tile
            row_ids = start + lax.broadcasted_iota(jnp.int32, (tile, 1), 0)
            _accumulate(jnp.where(row_ids < rows, e, 0.0))
    else:
        _accumulate(e)


def _chip_profile():
    """(num_parts, vmem_budget_bytes) for the current TPU generation."""
    kind = ""
    try:
        kind = (jax.devices()[0].device_kind or "").lower()
    except Exception:
        pass
    if "v7" in kind or "7x" in kind:
        # v7x: 2 TensorCores/chip, but only 64 MiB VMEM per core -> keep headroom.
        return 2, 44 << 20
    # v5e / v6e: single TensorCore, 128 MiB physical VMEM.
    return 1, 64 << 20


def _pick_tile(rows, D, in_itemsize, vmem_budget, target_tile=4096):
    """Largest row tile (multiple of 8, <= rows, <= target) fitting the budget."""
    lanes = -(-D // 128) * 128  # D lane-pads in VMEM

    def need(t):
        # 2 inputs x 2 pipeline buffers + one f32 temp for the elementwise loss
        # + slack for accumulator/output blocks and compiler scratch.
        return 2 * 2 * t * lanes * in_itemsize + t * lanes * 4 + (2 << 20)

    tile = min(target_tile, max(8, (rows // 8) * 8))
    while tile > 8 and need(tile) > vmem_budget:
        tile = max(8, ((tile // 2) // 8) * 8)
    return tile


def _column_sums(pred2d, gt2d, loss_type):
    """Per-column sums (shape (D,), f32) of the elementwise loss."""
    rows, D = pred2d.shape

    # Degenerate tiny inputs only: pad to one full sublane group (copying < 8
    # rows is negligible; zero rows contribute 0 to every loss).
    if rows < 8:
        pad = 8 - rows
        pred2d = jnp.pad(pred2d, ((0, pad), (0, 0)))
        gt2d = jnp.pad(gt2d, ((0, pad), (0, 0)))
        rows = 8

    num_parts, vmem_budget = _chip_profile()
    tile = _pick_tile(rows, D, jnp.dtype(pred2d.dtype).itemsize, vmem_budget)
    total_steps = -(-rows // tile)                    # cdiv; ragged tail masked in-kernel
    if num_parts > total_steps:
        num_parts = 1
    steps_per_part = -(-total_steps // num_parts)     # cdiv
    has_tail = (rows % tile != 0) or (num_parts * steps_per_part != total_steps)

    kernel = functools.partial(
        _recons_loss_kernel, loss_type=loss_type, rows=rows, tile=tile,
        total_steps=total_steps, steps_per_part=steps_per_part,
        num_parts=num_parts, has_tail=has_tail)

    last = total_steps - 1
    if num_parts > 1:
        # v7x: leading "parallel" axis shards the row range across both TCs.
        grid = (num_parts, steps_per_part)
        in_map = lambda p, j: (jnp.minimum(p * steps_per_part + j, last), 0)
        out_map = lambda p, j: (p, 0, 0)
        dim_sem = ("parallel", "arbitrary")
    else:
        # v5e / v6e: single TensorCore -> plain 1-D grid over row tiles.
        grid = (total_steps,)
        in_map = lambda j: (j, 0)
        out_map = lambda j: (0, 0, 0)
        dim_sem = ("arbitrary",)

    parts = pl.pallas_call(
        kernel,
        out_shape=jax.ShapeDtypeStruct((num_parts, 8, D), jnp.float32),
        grid_spec=pltpu.PrefetchScalarGridSpec(
            num_scalar_prefetch=0,
            grid=grid,
            in_specs=[
                pl.BlockSpec((tile, D), in_map),
                pl.BlockSpec((tile, D), in_map),
            ],
            # Output block depends only on the partition index -> acts as a
            # per-partition (8, D) accumulator resident across the step axis.
            out_specs=pl.BlockSpec((None, 8, D), out_map),
        ),
        compiler_params=pltpu.CompilerParams(
            dimension_semantics=dim_sem,
            vmem_limit_bytes=vmem_budget,
        ),
    )(pred2d, gt2d)

    # Tiny finalize outside the kernel: (num_parts, 8, D) -> (D,)
    return jnp.sum(parts, axis=(0, 1))


class ReConsLossPallas:
    """Pallas port of utils/losses.py::ReConsLoss (forward + forward_vel)."""

    def __init__(self, recons_loss="l2", nb_joints=22, mode="together"):
        assert recons_loss in ("l1", "l2", "l1_smooth")
        self.loss_type = recons_loss
        self.nb_joints = nb_joints
        # Kept for parity with the PyTorch module (unused by forward, as in torch).
        self.motion_dim = (nb_joints - 1) * 12 + 4 + 3 + 4
        self.mode = mode

    def _col_sums(self, motion_pred, motion_gt):
        B, T, D = motion_pred.shape
        pred2d = motion_pred.reshape(B * T, D)   # metadata-only reshape, no copy
        gt2d = motion_gt.reshape(B * T, D)
        return _column_sums(pred2d, gt2d, self.loss_type), (B, T, D)

    def __call__(self, motion_pred, motion_gt):
        col_sums, (B, T, D) = self._col_sums(motion_pred, motion_gt)
        if self.mode == "together":
            return jnp.sum(col_sums) / (B * T * D)
        elif self.mode == "separate":
            # Same hard-coded indices as the PyTorch module: rot = range(33)\{3,4,5},
            # trans = {3,4,5} (independent of nb_joints).  Slice sums, no gather.
            sum33 = jnp.sum(col_sums[:33])
            trans_sum = jnp.sum(col_sums[3:6])
            rot_loss = (sum33 - trans_sum) / (B * T * 30)
            trans_loss = trans_sum / (B * T * 3)
            loss = 0.7 * rot_loss + 20.0 * trans_loss
            return loss, rot_loss, trans_loss
        else:
            raise ValueError(f"unknown mode: {self.mode}")

    def forward_vel(self, motion_pred, motion_gt):
        col_sums, (B, T, D) = self._col_sums(motion_pred, motion_gt)
        lo, hi = 4, (self.nb_joints - 1) * 3 + 4
        return jnp.sum(col_sums[lo:hi]) / (B * T * (hi - lo))

    # TODO(synk): penetration_loss depends on an external OpenSim/Nimble skeleton
    # (GetLowestPointLayer) and has no Pallas equivalent; not implemented.


# --------------------------- pure-JAX reference ------------------------------

def _ref_elementwise(d, loss_type):
    if loss_type == "l2":
        return d * d
    if loss_type == "l1":
        return jnp.abs(d)
    ad = jnp.abs(d)
    return jnp.where(ad < 1.0, 0.5 * d * d, ad - 0.5)


def _ref_forward(pred, gt, loss_type, mode):
    e = _ref_elementwise(pred.astype(jnp.float32) - gt.astype(jnp.float32), loss_type)
    if mode == "together":
        return jnp.mean(e)
    rot_idx = jnp.array([i for i in range(33) if i not in (3, 4, 5)])
    rot = jnp.mean(e[:, :, rot_idx])
    trans = jnp.mean(e[:, :, jnp.array([3, 4, 5])])
    return 0.7 * rot + 20.0 * trans, rot, trans


def _ref_forward_vel(pred, gt, loss_type, nb_joints):
    lo, hi = 4, (nb_joints - 1) * 3 + 4
    e = _ref_elementwise(pred.astype(jnp.float32) - gt.astype(jnp.float32), loss_type)
    return jnp.mean(e[..., lo:hi])


if __name__ == "__main__":
    key = jax.random.PRNGKey(0)
    k1, k2 = jax.random.split(key)
    B, T, nb_joints = 2, 8, 22
    D = (nb_joints - 1) * 12 + 4 + 3 + 4  # 263, as in the original module
    motion_pred = jax.random.normal(k1, (B, T, D), dtype=jnp.float32)
    motion_gt = jax.random.normal(k2, (B, T, D), dtype=jnp.float32)

    ok = True
    for loss_type in ("l1", "l2", "l1_smooth"):
        # mode='together'
        mod_t = ReConsLossPallas(recons_loss=loss_type, nb_joints=nb_joints, mode="together")
        out_t = jax.block_until_ready(mod_t(motion_pred, motion_gt))
        ref_t = _ref_forward(motion_pred, motion_gt, loss_type, "together")
        ok &= bool(jnp.allclose(out_t, ref_t, rtol=1e-5, atol=1e-6))

        # mode='separate'
        mod_s = ReConsLossPallas(recons_loss=loss_type, nb_joints=nb_joints, mode="separate")
        loss, rot_loss, trans_loss = mod_s(motion_pred, motion_gt)
        jax.block_until_ready(loss)
        ref_loss, ref_rot, ref_trans = _ref_forward(motion_pred, motion_gt, loss_type, "separate")
        ok &= bool(jnp.allclose(loss, ref_loss, rtol=1e-5, atol=1e-6))
        ok &= bool(jnp.allclose(rot_loss, ref_rot, rtol=1e-5, atol=1e-6))
        ok &= bool(jnp.allclose(trans_loss, ref_trans, rtol=1e-5, atol=1e-6))

        # forward_vel
        vel = jax.block_until_ready(mod_t.forward_vel(motion_pred, motion_gt))
        ref_vel = _ref_forward_vel(motion_pred, motion_gt, loss_type, nb_joints)
        ok &= bool(jnp.allclose(vel, ref_vel, rtol=1e-5, atol=1e-6))

    # Ragged-tail exercise (rows not a multiple of the tile / of 8) to cover the
    # in-kernel masking path at small scale.
    B2, T2 = 3, 7   # rows = 21
    p2 = jax.random.normal(k1, (B2, T2, D), dtype=jnp.float32)
    g2 = jax.random.normal(k2, (B2, T2, D), dtype=jnp.float32)
    mod2 = ReConsLossPallas(recons_loss="l2", nb_joints=nb_joints, mode="together")
    out2 = jax.block_until_ready(mod2(p2, g2))
    ok &= bool(jnp.allclose(out2, _ref_forward(p2, g2, "l2", "together"),
                            rtol=1e-5, atol=1e-6))

    if ok:
        print("KERNEL_OK")
    else:
        print("KERNEL_MISMATCH")
</pallas_src>

<mosaic_0001>
module attributes {stable_mosaic.version = 11 : i64} {
  func.func @_recons_loss_kernel(%arg0: i32, %arg1: memref<16x263xf32, #tpu.memory_space<vmem>>, %arg2: memref<16x263xf32, #tpu.memory_space<vmem>>, %arg3: memref<1x8x263xf32, #tpu.memory_space<vmem>>) attributes {dimension_semantics = [#tpu.dimension_semantics<arbitrary>], iteration_bounds = array<i64: 1>, scalar_prefetch = 0 : i64, scratch_operands = 0 : i64, tpu.core_type = #tpu.core_type<tc>, window_params = [{transform_indices = @transform_0, window_bounds = array<i64: 16, 263>}, {transform_indices = @transform_1, window_bounds = array<i64: 16, 263>}, {pipeline_mode = #tpu.pipeline_mode<synchronous>, transform_indices = @transform_2, window_bounds = array<i64: 1, 8, 263>}]} {
    %c0_i32 = arith.constant 0 : i32
    %0 = arith.cmpi eq, %arg0, %c0_i32 : i32
    %1 = arith.extui %0 : i1 to i32
    %c0_i32_0 = arith.constant 0 : i32
    %2 = arith.cmpi ne, %1, %c0_i32_0 : i32
    scf.if %2 {
      %cst_10 = arith.constant 0.000000e+00 : f32
      %15 = vector.broadcast %cst_10 : f32 to vector<8x263xf32>
      %c0_11 = arith.constant 0 : index
      %c0_12 = arith.constant 0 : index
      %c0_13 = arith.constant 0 : index
      %16 = vector.load %arg3[%c0_11, %c0_12, %c0_13] : memref<1x8x263xf32, #tpu.memory_space<vmem>>, vector<1x8x263xf32>
      %17 = vector.shape_cast %16 : vector<1x8x263xf32> to vector<8x263xf32>
      %18 = vector.shape_cast %15 : vector<8x263xf32> to vector<1x8x263xf32>
      tpu.vector_store %arg3[%c0_11, %c0_12, %c0_13], %18 {strides = array<i32>} : memref<1x8x263xf32, #tpu.memory_space<vmem>>, vector<1x8x263xf32>,
    } else {
    }
    %c0 = arith.constant 0 : index
    %c0_1 = arith.constant 0 : index
    %3 = vector.load %arg1[%c0, %c0_1] : memref<16x263xf32, #tpu.memory_space<vmem>>, vector<16x263xf32>
    %c0_2 = arith.constant 0 : index
    %c0_3 = arith.constant 0 : index
    %4 = vector.load %arg2[%c0_2, %c0_3] : memref<16x263xf32, #tpu.memory_space<vmem>>, vector<16x263xf32>
    %5 = arith.subf %3, %4 : vector<16x263xf32>
    %6 = math.absf %5 : vector<16x263xf32>
    %c0_4 = arith.constant 0 : index
    %c0_5 = arith.constant 0 : index
    %c0_6 = arith.constant 0 : index
    %7 = vector.load %arg3[%c0_4, %c0_5, %c0_6] : memref<1x8x263xf32, #tpu.memory_space<vmem>>, vector<1x8x263xf32>
    %8 = vector.shape_cast %7 : vector<1x8x263xf32> to vector<8x263xf32>
    %9 = vector.shape_cast %6 : vector<16x263xf32> to vector<2x8x263xf32>
    %cst = arith.constant dense<0.000000e+00> : vector<8x263xf32>
    %10 = vector.multi_reduction <add>, %9, %cst [0] : vector<2x8x263xf32> to vector<8x263xf32>
    %11 = arith.addf %8, %10 : vector<8x263xf32>
    %c0_7 = arith.constant 0 : index
    %c0_8 = arith.constant 0 : index
    %c0_9 = arith.constant 0 : index
    %12 = vector.load %arg3[%c0_7, %c0_8, %c0_9] : memref<1x8x263xf32, #tpu.memory_space<vmem>>, vector<1x8x263xf32>
    %13 = vector.shape_cast %12 : vector<1x8x263xf32> to vector<8x263xf32>
    %14 = vector.shape_cast %11 : vector<8x263xf32> to vector<1x8x263xf32>
    tpu.vector_store %arg3[%c0_7, %c0_8, %c0_9], %14 {strides = array<i32>} : memref<1x8x263xf32, #tpu.memory_space<vmem>>, vector<1x8x263xf32>,
    return
  }
  func.func @transform_0(%arg0: i32) -> (i32, i32) {
    %c0_i32 = arith.constant 0 : i32
    %c0_i32_0 = arith.constant 0 : i32
    return %arg0, %c0_i32 : i32, i32
  }
  func.func @transform_1(%arg0: i32) -> (i32, i32) {
    %c0_i32 = arith.constant 0 : i32
    %c0_i32_0 = arith.constant 0 : i32
    return %arg0, %c0_i32 : i32, i32
  }
  func.func @transform_2(%arg0: i32) -> (i32, i32, i32) {
    %c0_i32 = arith.constant 0 : i32
    %c0_i32_0 = arith.constant 0 : i32
    %c0_i32_1 = arith.constant 0 : i32
    %c0_i32_2 = arith.constant 0 : i32
    return %c0_i32, %c0_i32_0, %c0_i32_1 : i32, i32, i32
  }
}

</mosaic_0001>

<bundles_post_ra>
// kernel: tpu_custom_call.1
= control target key start
LH: loop header
LB: loop body
LE: loop exit
PB: predicated region body
PF: predicated region fallthrough
CT: control target
= control target key end

     0   :  { %7 = vsyncpa [#allocation3], 0  ;;  %s227_s0 = inlined_call_operand.hbm [shape: f32[16,263], index: 0, kind: input, shape index: {}]   ;;  %s228_s1 = inlined_call_operand.hbm [shape: f32[16,263], index: 1, kind: input, shape index: {}]   ;;  %s229_s2 = inlined_call_operand.hbm [shape: f32[1,8,263], index: 2, kind: output, shape index: {}]  }
   0x1   :  { %8 = vsyncpa [#allocation6], 0 }
   0x2   :  { %9 = vsyncpa [#allocation4], 0  ;;  %s14_s11 = sshll.u32 %s227_s0, 4  ;;  %s193_s12 = smov [#allocation2]   ;;  %s15_s11 = int_to_ptr.hbm [resolvable:$true] %s14_s11 }
   0x3   :  { %s16_s13 = sshll.u32 %s193_s12, 4  ;;  %s27_s16 = sshll.u32 %s228_s1, 4  ;;  %s17_s13 = int_to_ptr.vmem [resolvable:$true] %s16_s13  ;;  %s28_s16 = int_to_ptr.hbm [resolvable:$true] %s27_s16 }
   0x4   :  { %s194_s17 = smov 384   ;;  %s195_s18 = smov 24  }
   0x5   :  { %22 = dma.hbm_to_vmem [thread:$0]  %s15_s11, 768, %s17_s13, [#allocation3], %s194_s17, %s194_s17, %s195_s18  }
   0x6   :  { %s196_s19 = smov [#allocation5]  }
   0x7   :  { %s29_s20 = sshll.u32 %s196_s19, 4  ;;  %s30_s20 = int_to_ptr.vmem [resolvable:$true] %s29_s20 }
   0x8   :  { %35 = dma.hbm_to_vmem [thread:$0]  %s28_s16, 768, %s30_s20, [#allocation6], %s194_s17, %s194_s17, %s195_s18  }
   0x9   :  { %187 = dma.done.wait [#allocation3], 768  }
   0xa   :  { %188 = vsyncadd [#allocation3], 4294966528 }
   0xb   :  { %189 = dma.done.wait [#allocation6], 768  }
   0xc   :  { %190 = vsyncadd [#allocation6], 4294966528  ;;  %vm50_vm0 = vcmask 56320   ;;  %v197_v0 = vmov 0.0   ;;  %v54_v1 = vld [vmem:[#allocation2 + $0x10] sm:$0xff]  ;;  %v57_v2 = vld [vmem:[#allocation2 + $0x28] sm:$0xff] }
   0xd   :  { %51 = vst.msk [vmem:[#allocation7 + $0x10] sm:$0xff] %vm50_vm0, %v197_v0  ;;  %v60_v3 = vld [vmem:[#allocation5 + $0x10] sm:$0xff]  ;;  %v63_v4 = vld [vmem:[#allocation5 + $0x28] sm:$0xff]  ;;  %v58_v9 = vld [vmem:[#allocation5] sm:$0xff]  ;;  %s198_s0 = smov [#allocation7]   ;;  %s98_s23 = sshll.u32 %s229_s2, 4  ;;  %s99_s23 = int_to_ptr.hbm [resolvable:$true] %s98_s23 }
   0xe   :  { %v66_v5 = vsub.f32 %v54_v1, %v60_v3  ;;  %v52_v6 = vld [vmem:[#allocation2] sm:$0xff]  ;;  %v55_v7 = vld [vmem:[#allocation2 + $0x18] sm:$0xff]  ;;  %v69_v8 = vsub.f32 %v57_v2, %v63_v4  ;;  %v61_v10 = vld [vmem:[#allocation5 + $0x18] sm:$0xff]  ;;  %s96_s1 = sshll.u32 %s198_s0, 4  ;;  %s97_s1 = int_to_ptr.vmem [resolvable:$true] %s96_s1 }
   0xf   :  { %v53_v11 = vld [vmem:[#allocation2 + $0x8] sm:$0xff]  ;;  %v64_v13 = vsub.f32 %v52_v6, %v58_v9  ;;  %v67_v14 = vsub.f32 %v55_v7, %v61_v10  ;;  %v56_v15 = vld [vmem:[#allocation2 + $0x20] sm:$0xff]  ;;  %v59_v16 = vld [vmem:[#allocation5 + $0x8] sm:$0xff] }
  0x10   :  { %v72_v12 = vand.u32 2147483647, %v66_v5  ;;  %v62_v17 = vld [vmem:[#allocation5 + $0x20] sm:$0xff]  ;;  %v75_v18 = vand.u32 2147483647, %v69_v8  ;;  %v65_v19 = vsub.f32 %v53_v11, %v59_v16 }
  0x11   :  { %v68_v20 = vsub.f32 %v56_v15, %v62_v17  ;;  %v70_v22 = vand.u32 2147483647, %v64_v13  ;;  %v73_v23 = vand.u32 2147483647, %v67_v14 }
  0x12   :  { %v82_v21 = vsel %vm50_vm0, %v72_v12, 0.0  ;;  %v83_v24 = vsel %vm50_vm0, %v75_v18, 0.0  ;;  %v71_v25 = vand.u32 2147483647, %v65_v19 }
  0x13   :  { %v74_v26 = vand.u32 2147483647, %v68_v20  ;;  %v84_v28 = vadd.f32 %v83_v24, %v82_v21  ;;  %v79_v29 = vadd.f32 %v73_v23, %v70_v22 }
  0x14   :  { %v78_v27 = vld [vmem:[#allocation7 + $0x10] sm:$0xff] }
  0x15   :  { %v80_v30 = vadd.f32 %v74_v26, %v71_v25  ;;  %v87_v31 = vadd.f32 %v84_v28, %v78_v27  ;;  %88 = vst [vmem:[#allocation7] sm:$0xff] %v79_v29 }
  0x17   :  { %89 = vst [vmem:[#allocation7 + $0x8] sm:$0xff] %v80_v30 }
  0x18   :  { %90 = vst.msk [vmem:[#allocation7 + $0x10] sm:$0xff] %vm50_vm0, %v87_v31 }
  0x19   :  { %101 = dma.vmem_to_hbm [thread:$0]  %s97_s1, 384, %s99_s23, [#allocation4]  }
  0x1a   :  { %191 = dma.done.wait [#allocation4], 384  }
  0x1b   :  { %192 = vsyncadd [#allocation4], 4294966912 }
  0x1c   :  { %106 = vsyncpa [#allocation3], 1 }
  0x1d   :  { %107 = vsyncpa [#allocation6], 1 }
  0x1e   :  { %108 = vsyncpa [#allocation4], 1 }

</bundles_post_ra>
